<compile_context>
chip_gen: v7x
topology: tpu7x:2x2x1
jax: 0.10.0
libtpu: 0.0.40
codegen_flags: <defaults>
</compile_context>

<pallas_src>
import jax
import jax.numpy as jnp
from jax.experimental import pallas as pl
from jax.experimental.pallas import tpu as pltpu


def _ts_kernel(b_ref, xt_ref, w_ref, pred_ref):
    # b_ref    : SMEM (1,)   f32   folded bias   (W_dec @ b_enc + b_dec)
    # xt_ref   : VMEM (F, B) f32   input, transposed (batch on the lane axis)
    # w_ref    : VMEM (F, 1) f32   folded weight (W_dec @ W_enc)^T
    # pred_ref : VMEM (1, B) f32   decoder output, lane-major
    #
    # Single folded linear:  pred = x @ (W_dec @ W_enc)^T + b_comb.
    # K=10 / N=1 is far too small for the MXU -> VPU multiply + sublane
    # reduction (XLU); output stays lane-major with batch on the lanes.
    prod = xt_ref[...] * w_ref[...]                               # (F, B)
    pred_ref[...] = jnp.sum(prod, axis=0, keepdims=True) + b_ref[0]


def mock_time_series_forward(x, params, target_len, *, key):
    """Replicates MockTimeSeriesModel.forward.

    Returns (predictions, attention_weights) with
      predictions:        (batch, target_len, 1)
      attention_weights:  dict of standard-normal tensors (torch.randn semantics).
    """
    w_enc, b_enc, w_dec, b_dec = params
    batch, in_features = x.shape

    # Trace-time folding (valid: no activation between encoder and decoder).
    w_comb = (w_dec @ w_enc).reshape(in_features, 1).astype(jnp.float32)   # (10, 1)
    b_comb = (w_dec @ b_enc + b_dec).reshape(1).astype(jnp.float32)        # (1,)
    x_t = x.astype(jnp.float32).T                                          # (10, B)

    smem = pl.BlockSpec(memory_space=pltpu.MemorySpace.SMEM)
    vmem = pl.BlockSpec(memory_space=pltpu.MemorySpace.VMEM)

    bytes_accessed = 4 * (x_t.size + w_comb.size + b_comb.size + batch)
    pred = pl.pallas_call(
        _ts_kernel,
        out_shape=jax.ShapeDtypeStruct((1, batch), jnp.float32),
        in_specs=[smem, vmem, vmem],
        out_specs=vmem,
        cost_estimate=pl.CostEstimate(
            flops=2 * batch * in_features,
            transcendentals=0,
            bytes_accessed=bytes_accessed,
        ),
    )(b_comb, x_t, w_comb)

    # The torch loop applies the same decoder to the same features every step,
    # so broadcast over target_len in the wrapper (outside the kernel).
    predictions = jnp.broadcast_to(pred.T[:, None, :], (batch, target_len, 1))

    # torch.randn(...) attention weights: standard normals of the right shapes.
    k_enc, k_dec = jax.random.split(key)
    attention_weights = {
        "encoder_attention": jax.random.normal(k_enc, (batch, 8, 48, 48), jnp.float32),
        "decoder_attention": jax.random.normal(k_dec, (batch, 8, target_len, 48), jnp.float32),
    }
    return predictions, attention_weights


def init_params(key):
    # encoder: Linear(10, 64) -> weight (64, 10), bias (64,)
    # decoder: Linear(64, 1)  -> weight (1, 64),  bias (1,)
    k1, k2, k3, k4 = jax.random.split(key, 4)
    w_enc = jax.random.normal(k1, (64, 10), jnp.float32) * 0.1
    b_enc = jax.random.normal(k2, (64,), jnp.float32) * 0.1
    w_dec = jax.random.normal(k3, (1, 64), jnp.float32) * 0.1
    b_dec = jax.random.normal(k4, (1,), jnp.float32) * 0.1
    return w_enc, b_enc, w_dec, b_dec


if __name__ == "__main__":
    key = jax.random.PRNGKey(0)
    k_param, k_x, k_attn = jax.random.split(key, 3)

    params = init_params(k_param)

    batch = 4
    target_len = 8
    x = jax.random.normal(k_x, (batch, 10), jnp.float32)

    predictions, attn = mock_time_series_forward(x, params, target_len, key=k_attn)

    predictions = jax.block_until_ready(predictions)
    enc_attn = jax.block_until_ready(attn["encoder_attention"])
    dec_attn = jax.block_until_ready(attn["decoder_attention"])

    # --- correctness checks vs. pure-JAX two-step reference ---
    feats_ref = x @ params[0].T + params[1]
    dec_ref = feats_ref @ params[2].T + params[3]                       # (B, 1)
    pred_ref = jnp.broadcast_to(dec_ref[:, None, :], (batch, target_len, 1))

    assert predictions.shape == (batch, target_len, 1)
    assert enc_attn.shape == (batch, 8, 48, 48)
    assert dec_attn.shape == (batch, 8, target_len, 48)
    assert jnp.allclose(predictions, pred_ref, atol=1e-4, rtol=1e-4)

    # loose sanity check that the random attention weights are ~N(0, 1)
    assert bool(jnp.all(jnp.isfinite(enc_attn))) and bool(jnp.all(jnp.isfinite(dec_attn)))
    assert abs(float(enc_attn.mean())) < 0.1 and 0.8 < float(enc_attn.std()) < 1.2
    assert abs(float(dec_attn.mean())) < 0.2 and 0.8 < float(dec_attn.std()) < 1.2

    print("KERNEL_OK")
</pallas_src>

<mosaic_0001>
module attributes {stable_mosaic.version = 11 : i64} {
  func.func @_ts_kernel(%arg0: memref<1xf32, #tpu.memory_space<smem>>, %arg1: memref<10x4xf32, #tpu.memory_space<vmem>>, %arg2: memref<10x1xf32, #tpu.memory_space<vmem>>, %arg3: memref<1x4xf32, #tpu.memory_space<vmem>>) attributes {dimension_semantics = [], scalar_prefetch = 0 : i64, scratch_operands = 0 : i64, tpu.core_type = #tpu.core_type<tc>} {
    %c0 = arith.constant 0 : index
    %c0_0 = arith.constant 0 : index
    %0 = vector.load %arg1[%c0, %c0_0] : memref<10x4xf32, #tpu.memory_space<vmem>>, vector<10x4xf32>
    %c0_1 = arith.constant 0 : index
    %c0_2 = arith.constant 0 : index
    %1 = vector.load %arg2[%c0_1, %c0_2] : memref<10x1xf32, #tpu.memory_space<vmem>>, vector<10x1xf32>
    %2 = vector.broadcast %1 : vector<10x1xf32> to vector<10x4xf32>
    %3 = arith.mulf %0, %2 : vector<10x4xf32>
    %cst = arith.constant dense<0.000000e+00> : vector<4xf32>
    %4 = vector.multi_reduction <add>, %3, %cst [0] : vector<10x4xf32> to vector<4xf32>
    %5 = vector.shape_cast %4 : vector<4xf32> to vector<1x4xf32>
    %c0_3 = arith.constant 0 : index
    %6 = memref.load %arg0[%c0_3] : memref<1xf32, #tpu.memory_space<smem>>
    %7 = vector.broadcast %6 : f32 to vector<1x4xf32>
    %8 = arith.addf %5, %7 : vector<1x4xf32>
    %c0_4 = arith.constant 0 : index
    %c0_5 = arith.constant 0 : index
    %9 = vector.load %arg3[%c0_4, %c0_5] : memref<1x4xf32, #tpu.memory_space<vmem>>, vector<1x4xf32>
    tpu.vector_store %arg3[%c0_4, %c0_5], %8 {strides = array<i32>} : memref<1x4xf32, #tpu.memory_space<vmem>>, vector<1x4xf32>,
    return
  }
}

</mosaic_0001>

<bundles_post_ra>
// kernel: tpu_custom_call.1
= control target key start
LH: loop header
LB: loop body
LE: loop exit
PB: predicated region body
PF: predicated region fallthrough
CT: control target
= control target key end

     0   :  { %v89_v1 = vmov 0   ;;  %s138_s0 = inlined_call_operand.<no memory space> [shape: f32[1], index: 0, kind: input, shape index: {}]   ;;  %s139_s1 = inlined_call_operand.vmem [shape: f32[10,4], index: 1, kind: input, shape index: {}]   ;;  %s140_s2 = inlined_call_operand.vmem [shape: f32[10,1], index: 2, kind: input, shape index: {}]   ;;  %s141_s3 = inlined_call_operand.hbm [shape: f32[1,4], index: 3, kind: output, shape index: {}]  }
   0x1   :  { %v18_v0 = vld [vmem:[%s140_s2] sm:$0xff]  ;;  %64 = vset.pattern.permute.xlu0 %v89_v1 }
   0x2   :  { %9 = vsyncpa [#allocation4], 0  ;;  %22 = vperm.xlu0 %64, %v18_v0   ;;  %v19_v2 = vld [vmem:[%s140_s2 + $0x8] sm:$0x3]  ;;  %v16_v4 = vld [vmem:[%s139_s1] sm:$0xff]  ;;  %vm32_vm0 = vcmask 31744   ;;  %v44_v17 = vstv %s138_s0 }
   0x3   :  { %v17_v5 = vld [vmem:[%s139_s1 + $0x8] sm:$0x3]  ;;  %vm34_vm1 = vcmask 25600   ;;  %s90_s21 = smov [#allocation3]   ;;  %vm46_vm2 = vcmask 24576  }
   0x4   :  { %s54_s22 = sshll.u32 %s90_s21, 4  ;;  %s55_s22 = int_to_ptr.vmem [resolvable:$true] %s54_s22 }
   0x5   :  { %s65_s1 = scalar_lea.vmem %s55_s22, 16  ;;  %s69_s23 = scalar_lea.vmem %s55_s22, 32 }
   0x6   :  { %27 = vperm.xlu0 %64, %v19_v2   ;;  %p66_p0 = scmp.ne.s32.totalorder %s55_s22, %s65_s1  ;;  %p70_p1 = scmp.lt.s32.totalorder %s55_s22, %s55_s22 }
   0x7   :  { %p71_p2 = scmp.lt.s32.totalorder %s69_s23, %s65_s1 }
   0x9   :  { %p72_p3 = por %p71_p2, %p70_p1 }
   0xb   :  { %p73_p4 = pnand %p72_p3, %p66_p0 }
  0x81   :  { %v23_v3 = vpop.permute.xlu0 %22 }
  0x82   :  { %v30_v6 = vmul.f32 %v23_v3, %v16_v4 }
  0x84   :  { %v33_v9 = vsel %vm32_vm0, %v30_v6, 0.0 }
  0x85   :  { %v28_v7 = vpop.permute.xlu0 %27 }
  0x86   :  { %v31_v8 = vmul.f32 %v28_v7, %v17_v5 }
  0x88   :  { %v35_v10 = vsel %vm34_vm1, %v31_v8, 0.0 }
  0x89   :  { %v36_v11 = vadd.f32 %v35_v10, %v33_v9 }
  0x8b   :  { %v37_v12 = vrot.slane %v36_v11, 4 }
  0x8d   :  { %v38_v13 = vadd.f32 %v37_v12, %v36_v11 }
  0x8f   :  { %v39_v14 = vrot.slane %v38_v13, 2 }
  0x91   :  { %v40_v15 = vadd.f32 %v39_v14, %v38_v13 }
  0x93   :  { %v41_v16 = vrot.slane %v40_v15, 1 }
  0x95   :  { %v42_v18 = vadd.f32 %v41_v16, %v40_v15 }
  0x97   :  { %v45_v19 = vadd.f32 %v44_v17, %v42_v18 }
  0x99   :  { %47 = vst.msk [vmem:[#allocation3] sm:$0x1] %vm46_vm2, %v45_v19 }
  0x9a   :  { %76 = shalt.err (!%p73_p4)
}
  0x9b   :  { %s77_s26 = scalar_lea.hbm %s141_s3, 16 }
  0x9c   :  { %p78_p5 = scmp.ne.s32.totalorder %s141_s3, %s77_s26  ;;  %p81_p6 = scmp.lt.u32.totalorder %s77_s26, %s141_s3 }
  0x9e   :  { %p83_p7 = pnand %p81_p6, %p78_p5 }
  0xa0   :  { %86 = shalt.err (!%p83_p7)
}
  0xa1   :  { %57 = dma.vmem_to_hbm [thread:$0]  %s55_s22, 16, %s141_s3, [#allocation4]  }
  0xa2   :  { %87 = dma.done.wait [#allocation4], 16  }
  0xa3   :  { %88 = vsyncadd [#allocation4], 4294967280 }
  0xa4   :  { %61 = vsyncpa [#allocation4], 1 }

</bundles_post_ra>
